<compile_context>
chip_gen: v7x
topology: tpu7x:2x2x1
jax: 0.10.0
libtpu: 0.0.40
codegen_flags: <defaults>
</compile_context>

<pallas_src>
import jax
import jax.numpy as jnp
from jax.experimental import pallas as pl
from jax.experimental.pallas import tpu as pltpu


def _add_bias_kernel(x_ref, b_ref, o_ref):
    # x_ref: (Rb, Sb) slab; b_ref: (Rb, 1) or (1, Sb) bias block (broadcasts).
    o_ref[...] = x_ref[...] + b_ref[...]


def _sublane_multiple(itemsize):
    # fp32 -> 8, bf16 -> 16, int8/fp8 -> 32 sublane packing.
    return max(8, 32 // itemsize)


_MIN_SLAB_BYTES = 1 << 20      # don't shrink slabs below ~1 MiB when splitting the grid
_TARGET_SLAB_BYTES = 6 << 20   # ~6 MiB input slab; 2x2x6 MiB double-buffered in+out


def _choose_tiles_2d(R, S, itemsize, target_bytes=_TARGET_SLAB_BYTES):
    """Pick a lane-dense (Rb, Sb) block for a (R, S) array."""
    sub = _sublane_multiple(itemsize)

    # Lane (last) dim: full extent when it fits (always legal, even if not a
    # multiple of 128); otherwise the largest multiple of 128 within budget.
    if S < 128 or S * sub * itemsize <= target_bytes:
        Sb = S
    else:
        Sb = (target_bytes // (sub * itemsize)) // 128 * 128
        Sb = max(128, min(Sb, (S // 128) * 128))

    # Sublane (second-to-last) dim: multiple of the packing factor (or full R).
    if R <= sub:
        Rb = R
    else:
        max_rows = max(sub, (target_bytes // (Sb * itemsize)) // sub * sub)
        Rb = max(sub, min(max_rows, (R // sub) * sub))

    # Keep enough grid steps for megacore / 2-TC sharding, but never shrink a
    # slab below ~1 MiB (per-step overhead would start to show).
    def _steps(rb, sb):
        return pl.cdiv(R, rb) * pl.cdiv(S, sb)

    while _steps(Rb, Sb) < 4:
        if Rb > sub and (Rb // 2) * Sb * itemsize >= _MIN_SLAB_BYTES:
            Rb = max(sub, ((Rb // 2) + sub - 1) // sub * sub)
        elif (Sb > 128 and Sb % 128 == 0
              and Rb * (Sb // 2) * itemsize >= _MIN_SLAB_BYTES):
            Sb = max(128, ((Sb // 2) + 127) // 128 * 128)
        else:
            break

    return Rb, Sb


def learnable_bias(x, bias, *, donate_x=False):
    """LearnableBias forward: out = x + bias.expand_as(x).

    x: (N, C, H, W); bias: (1, C, 1, 1).  Computes in
    promote_types(x.dtype, bias.dtype) to match PyTorch type promotion.
    """
    N, C, H, W = x.shape
    assert bias.shape == (1, C, 1, 1), bias.shape
    HW = H * W

    out_dtype = jnp.promote_types(x.dtype, bias.dtype)
    itemsize = jnp.dtype(out_dtype).itemsize
    x = x.astype(out_dtype)
    bias = bias.astype(out_dtype)

    if HW >= 128:
        # Rows = N*C (dense sublane packing even for tiny C), lanes = H*W.
        R, S = N * C, HW
        x2 = x.reshape(R, S)
        b2 = jnp.broadcast_to(bias.reshape(1, C), (N, C)).reshape(R, 1)
        Rb, Sb = _choose_tiles_2d(R, S, itemsize)
        bias_spec = pl.BlockSpec((Rb, 1), lambda r, s: (r, 0))
    else:
        # Small feature maps: fold channels into the lane dim so stores stay
        # lane-dense; bias is expanded once to a (1, C*HW) row in the wrapper.
        R, S = N, C * HW
        x2 = x.reshape(R, S)
        b2 = jnp.repeat(bias.reshape(C), HW).reshape(1, S)
        Rb, Sb = _choose_tiles_2d(R, S, itemsize)
        bias_spec = pl.BlockSpec((1, Sb), lambda r, s: (0, s))

    grid = (pl.cdiv(R, Rb), pl.cdiv(S, Sb))

    # Explicit scoped-VMEM budget from the chosen tiles: double-buffered input
    # + output slabs, bias blocks and slack for internal scratch.  Portable
    # across v5e (16 MiB default) / v6e / v7x (32 MiB default, 64 MiB physical).
    slab_bytes = Rb * Sb * itemsize
    vmem_limit = 2 * 2 * slab_bytes + (2 << 20) + (2 << 20)
    vmem_limit = max(16 << 20, min(vmem_limit, 48 << 20))

    cost = pl.CostEstimate(
        flops=R * S,
        transcendentals=0,
        bytes_accessed=2 * R * S * itemsize + b2.size * itemsize,
    )

    out2 = pl.pallas_call(
        _add_bias_kernel,
        out_shape=jax.ShapeDtypeStruct((R, S), out_dtype),
        grid_spec=pltpu.PrefetchScalarGridSpec(
            num_scalar_prefetch=0,
            grid=grid,
            in_specs=[
                pl.BlockSpec((Rb, Sb), lambda r, s: (r, s)),
                bias_spec,
            ],
            out_specs=pl.BlockSpec((Rb, Sb), lambda r, s: (r, s)),
        ),
        compiler_params=pltpu.CompilerParams(
            dimension_semantics=("parallel", "parallel"),
            vmem_limit_bytes=vmem_limit,
        ),
        cost_estimate=cost,
        input_output_aliases={0: 0} if donate_x else {},
    )(x2, b2)

    return out2.reshape(N, C, H, W)


if __name__ == "__main__":
    N, C, H, W = 2, 4, 16, 16

    key = jax.random.PRNGKey(0)
    x = jax.random.normal(key, (N, C, H, W), dtype=jnp.float32)

    # nn.Parameter(torch.zeros(1, out_chn, 1, 1)) -> zeros init; perturb
    # deterministically so the add is actually exercised.
    bias = jnp.arange(C, dtype=jnp.float32).reshape(1, C, 1, 1) * 0.1

    out = learnable_bias(x, bias)
    out = jax.block_until_ready(out)

    ref = x + bias  # same broadcast semantics as PyTorch expand_as + add
    assert out.shape == x.shape and out.dtype == ref.dtype
    assert jnp.allclose(out, ref, atol=1e-6, rtol=1e-6)

    # Also exercise the small-feature-map (HW < 128) lane-dense path.
    x_small = jax.random.normal(jax.random.PRNGKey(1), (N, C, 7, 7), jnp.float32)
    out_small = jax.block_until_ready(learnable_bias(x_small, bias))
    assert jnp.allclose(out_small, x_small + bias, atol=1e-6, rtol=1e-6)

    print("KERNEL_OK")
</pallas_src>

<mosaic_0001>
module attributes {stable_mosaic.version = 11 : i64} {
  func.func @_add_bias_kernel(%arg0: i32, %arg1: i32, %arg2: memref<8x256xf32, #tpu.memory_space<vmem>>, %arg3: memref<8x1xf32, #tpu.memory_space<vmem>>, %arg4: memref<8x256xf32, #tpu.memory_space<vmem>>) attributes {dimension_semantics = [#tpu.dimension_semantics<parallel>, #tpu.dimension_semantics<parallel>], iteration_bounds = array<i64: 1, 1>, scalar_prefetch = 0 : i64, scratch_operands = 0 : i64, tpu.core_type = #tpu.core_type<tc>, window_params = [{transform_indices = @transform_0, window_bounds = array<i64: 8, 256>}, {transform_indices = @transform_1, window_bounds = array<i64: 8, 1>}, {transform_indices = @transform_2, window_bounds = array<i64: 8, 256>}]} {
    %c0 = arith.constant 0 : index
    %c0_0 = arith.constant 0 : index
    %0 = vector.load %arg2[%c0, %c0_0] : memref<8x256xf32, #tpu.memory_space<vmem>>, vector<8x256xf32>
    %c0_1 = arith.constant 0 : index
    %c0_2 = arith.constant 0 : index
    %1 = vector.load %arg3[%c0_1, %c0_2] : memref<8x1xf32, #tpu.memory_space<vmem>>, vector<8x1xf32>
    %2 = vector.broadcast %1 : vector<8x1xf32> to vector<8x256xf32>
    %3 = arith.addf %0, %2 : vector<8x256xf32>
    %c0_3 = arith.constant 0 : index
    %c0_4 = arith.constant 0 : index
    %4 = vector.load %arg4[%c0_3, %c0_4] : memref<8x256xf32, #tpu.memory_space<vmem>>, vector<8x256xf32>
    tpu.vector_store %arg4[%c0_3, %c0_4], %3 {strides = array<i32>} : memref<8x256xf32, #tpu.memory_space<vmem>>, vector<8x256xf32>,
    return
  }
  func.func @transform_0(%arg0: i32, %arg1: i32) -> (i32, i32) {
    %c0_i32 = arith.constant 0 : i32
    return %arg0, %arg1 : i32, i32
  }
  func.func @transform_1(%arg0: i32, %arg1: i32) -> (i32, i32) {
    %c0_i32 = arith.constant 0 : i32
    %c0_i32_0 = arith.constant 0 : i32
    return %arg0, %c0_i32 : i32, i32
  }
  func.func @transform_2(%arg0: i32, %arg1: i32) -> (i32, i32) {
    %c0_i32 = arith.constant 0 : i32
    return %arg0, %arg1 : i32, i32
  }
}

</mosaic_0001>

<bundles_post_ra>
// kernel: tpu_custom_call.1
= control target key start
LH: loop header
LB: loop body
LE: loop exit
PB: predicated region body
PF: predicated region fallthrough
CT: control target
= control target key end

     0   :  { %7 = vsyncpa [#allocation3], 0  ;;  %s148_s0 = inlined_call_operand.hbm [shape: f32[8,256], index: 0, kind: input, shape index: {}]   ;;  %s149_s1 = inlined_call_operand.vmem [shape: f32[8,1], index: 1, kind: input, shape index: {}]   ;;  %s150_s2 = inlined_call_operand.hbm [shape: f32[8,256], index: 2, kind: output, shape index: {}]  }
   0x1   :  { %8 = vsyncpa [#allocation4], 0  ;;  %s103_s9 = smov [#allocation2]   ;;  %s55_s13 = scalar_lea.hbm %s148_s0, 256 }
   0x2   :  { %s15_s10 = sshll.u32 %s103_s9, 4  ;;  %p56_p0 = scmp.ne.s32.totalorder %s148_s0, %s55_s13  ;;  %s16_s10 = int_to_ptr.vmem [resolvable:$true] %s15_s10 }
   0x3   :  { %p59_p1 = scmp.lt.u32.totalorder %s55_s13, %s148_s0 }
   0x5   :  { %p61_p2 = pnand %p59_p1, %p56_p0 }
   0x7   :  { %64 = shalt.err (!%p61_p2)
}
   0x8   :  { %s65_s18 = scalar_lea.vmem %s16_s10, 256  ;;  %p70_p4 = scmp.lt.s32.totalorder %s16_s10, %s16_s10 }
   0x9   :  { %p66_p3 = scmp.ne.s32.totalorder %s16_s10, %s65_s18  ;;  %p71_p5 = scmp.lt.s32.totalorder %s65_s18, %s65_s18 }
   0xb   :  { %p72_p6 = por %p71_p5, %p70_p4 }
   0xd   :  { %p73_p7 = pnand %p72_p6, %p66_p3 }
   0xf   :  { %76 = shalt.err (!%p73_p7)
}
  0x10   :  { %18 = dma.hbm_to_vmem [thread:$0]  %s148_s0, 256, %s16_s10, [#allocation3]  }
  0x11   :  { %99 = dma.done.wait [#allocation3], 256  }
  0x12   :  { %100 = vsyncadd [#allocation3], 4294967040  ;;  %v104_v0 = vmov 0   ;;  %v26_v1 = vld [vmem:[%s149_s1] sm:$0xff]  ;;  %v25_v3 = vld [vmem:[#allocation2 + $0x8] sm:$0xff]  ;;  %s105_s23 = smov [#allocation5]  }
  0x13   :  { %54 = vset.pattern.permute.xlu0 %v104_v0  ;;  %v24_v2 = vld [vmem:[#allocation2] sm:$0xff]  ;;  %s42_s24 = sshll.u32 %s105_s23, 4  ;;  %s43_s24 = int_to_ptr.vmem [resolvable:$true] %s42_s24 }
  0x14   :  { %29 = vperm.xlu0 %54, %v26_v1   ;;  %s77_s0 = scalar_lea.vmem %s43_s24, 256  ;;  %p82_p9 = scmp.lt.s32.totalorder %s43_s24, %s43_s24 }
  0x15   :  { %p78_p8 = scmp.ne.s32.totalorder %s43_s24, %s77_s0  ;;  %p83_p10 = scmp.lt.s32.totalorder %s77_s0, %s77_s0 }
  0x17   :  { %p84_p11 = por %p83_p10, %p82_p9 }
  0x19   :  { %p85_p12 = pnand %p84_p11, %p78_p8 }
  0x93   :  { %v30_v4 = vpop.permute.xlu0 %29 }
  0x94   :  { %v32_v5 = vadd.f32 %v30_v4, %v24_v2  ;;  %v33_v6 = vadd.f32 %v30_v4, %v25_v3 }
  0x96   :  { %34 = vst [vmem:[#allocation5] sm:$0xff] %v32_v5  ;;  %35 = vst [vmem:[#allocation5 + $0x8] sm:$0xff] %v33_v6 }
  0x97   :  { %88 = shalt.err (!%p85_p12)
}
  0x98   :  { %s89_s26 = scalar_lea.hbm %s150_s2, 256 }
  0x99   :  { %p90_p13 = scmp.ne.s32.totalorder %s150_s2, %s89_s26  ;;  %p93_p0 = scmp.lt.u32.totalorder %s89_s26, %s150_s2 }
  0x9b   :  { %p95_p1 = pnand %p93_p0, %p90_p13 }
  0x9d   :  { %98 = shalt.err (!%p95_p1)
}
  0x9e   :  { %45 = dma.vmem_to_hbm [thread:$0]  %s43_s24, 256, %s150_s2, [#allocation4]  }
  0x9f   :  { %101 = dma.done.wait [#allocation4], 256  }
  0xa0   :  { %102 = vsyncadd [#allocation4], 4294967040 }
  0xa1   :  { %49 = vsyncpa [#allocation3], 1 }
  0xa2   :  { %50 = vsyncpa [#allocation4], 1 }

</bundles_post_ra>
